<compile_context>
chip_gen: v6e
topology: v6e:2x2x1
jax: 0.10.0
libtpu: 0.0.40
codegen_flags: <defaults>
</compile_context>

<pallas_src>
import functools

import jax
import jax.numpy as jnp
from jax.experimental import pallas as pl
from jax.experimental.pallas import tpu as pltpu


def _round_up(x, m):
    return ((x + m - 1) // m) * m


# ---------------------------------------------------------------------------
# Kernels: out = x @ W_y + prev @ W3a^T (per sub-voxel group) + b
# ---------------------------------------------------------------------------
def _deup_cat_kernel_dense(x_ref, prev_ref, wy_ref, w3a_ref, b_ref, o_ref):
    # prev path as one dot against blockdiag(W3a^T) -> lane-dense, used for small Cg.
    y = jnp.dot(x_ref[...], wy_ref[...], preferred_element_type=jnp.float32)
    p = jnp.dot(prev_ref[...], w3a_ref[...], preferred_element_type=jnp.float32)
    o_ref[...] = (y + p + b_ref[...]).astype(o_ref.dtype)


def _deup_cat_kernel_grouped(x_ref, prev_ref, wy_ref, w3a_ref, b_ref, o_ref):
    # prev path as 8 per-group (tile,Cg)@(Cg,Cg) dots; used when Cg % 128 == 0 so group
    # slices stay lane-aligned.  Skips the 7/8 zero blocks of the block-diag formulation.
    y = jnp.dot(x_ref[...], wy_ref[...], preferred_element_type=jnp.float32)
    cg = w3a_ref.shape[0]
    parts = [
        jnp.dot(prev_ref[:, g * cg:(g + 1) * cg], w3a_ref[...],
                preferred_element_type=jnp.float32)
        for g in range(8)
    ]
    p = jnp.concatenate(parts, axis=1)
    o_ref[...] = (y + p + b_ref[...]).astype(o_ref.dtype)


# ---------------------------------------------------------------------------
# Glue: fold conv1/conv2/conv3 into two small matmul weights + one bias
# ---------------------------------------------------------------------------
def _fuse_params(params, Cin, Cout, compute_dtype):
    conv1_w, conv1_b, conv2_w, conv2_b, conv3_w, conv3_b = params
    w1 = conv1_w.reshape(Cout, Cin).astype(jnp.float32)          # (Cout, Cin)
    w3 = conv3_w.reshape(Cout, 2 * Cout).astype(jnp.float32)     # (Cout, 2*Cout)
    w3a, w3b = w3[:, :Cout], w3[:, Cout:]                        # prev half / y half
    b1 = conv1_b.astype(jnp.float32)
    b2 = conv2_b.astype(jnp.float32)
    b3 = conv3_b.astype(jnp.float32)

    Cg = _round_up(Cout, 16)          # per-group lane padding -> P = 8*Cg multiple of 128
    P = 8 * Cg
    grouped = (Cg % 128 == 0)

    # conv2 weight (Cin=Cout, Cout, kd, kh, kw) -> (Cout, 8, Cout), sub-voxel-group major.
    w2g = jnp.transpose(conv2_w.astype(jnp.float32), (0, 2, 3, 4, 1)).reshape(Cout, 8, Cout)
    # fold conv3's y-half into conv2, then fold conv1:
    w2s3 = jnp.einsum('mgj,oj->mgo', w2g, w3b)
    wy = jnp.einsum('mc,mgo->cgo', w1, w2s3)                      # (Cin, 8, Cout)
    wy = jnp.pad(wy, ((0, 0), (0, 0), (0, Cg - Cout))).reshape(Cin, P)

    w3a_pad = jnp.pad(w3a.T, ((0, Cg - Cout), (0, Cg - Cout)))    # (Cg, Cg)
    if grouped:
        w3a_mat = w3a_pad                                         # per-group weight
    else:
        w3a_mat = jnp.kron(jnp.eye(8, dtype=jnp.float32), w3a_pad)  # block-diag (P, P)

    # fully folded bias (b1 through W2*W3b, b2 through W3b, plus b3), kept f32.
    b_go = jnp.einsum('m,mgo->go', b1, w2s3) + (w3b @ b2)[None, :] + b3[None, :]
    b_all = jnp.pad(b_go, ((0, 0), (0, Cg - Cout))).reshape(1, P)

    return (wy.astype(compute_dtype), w3a_mat.astype(compute_dtype), b_all,
            Cg, P, grouped)


def _pick_tile(R, tile_rows, granule, Cin, P, Cg, grouped, cb, ob):
    # VMEM-aware cap: double-buffered x/prev/out streams + (double-buffered) weights must fit
    # within ~40 MiB of the 48 MiB scoped limit (safe on v7x's 64 MiB physical VMEM).
    budget = 40 * 1024 * 1024
    weight_bytes = 2 * ((Cin * P + (Cg * Cg if grouped else P * P)) * cb + P * 4)
    per_row = 2 * (Cin * cb + P * cb + P * ob)
    vmem_cap = max(granule, ((budget - weight_bytes) // max(per_row, 1) // granule) * granule)

    cap = max(granule, (int(tile_rows) // granule) * granule)
    cap = min(cap, vmem_cap, _round_up(R, granule))
    # keep >= 2 grid blocks so the "parallel" axis can shard over v7x's 2 TensorCores
    if R >= 2 * granule:
        cap = min(cap, _round_up((R + 1) // 2, granule))
    cap = max(cap, granule)

    # prefer a tile that divides R exactly -> no padded copies, no ragged tail
    t = cap
    while t >= granule:
        if R % t == 0:
            return t
        t -= granule
    return cap  # ragged last block: Pallas masks the partial output block


def _deup_cat_core(x_flat, prev_flat, fused, *, tile_rows, compute_dtype, out_dtype):
    wy, w3a, b_all, Cg, P, grouped = fused
    R, Cin = x_flat.shape
    cb = jnp.dtype(compute_dtype).itemsize
    ob = jnp.dtype(out_dtype).itemsize
    granule = 16 if cb <= 2 else 8

    x_flat = x_flat.astype(compute_dtype)
    prev_flat = prev_flat.astype(compute_dtype)

    tile = _pick_tile(R, tile_rows, granule, Cin, P, Cg, grouped, cb, ob)
    grid_r = pl.cdiv(R, tile)

    flops = 2 * R * P * (Cin + (Cg if grouped else P))
    bytes_accessed = (R * Cin * cb + R * P * cb + R * P * ob
                      + Cin * P * cb + (Cg * Cg if grouped else P * P) * cb + P * 4)
    cost = pl.CostEstimate(flops=int(flops), transcendentals=0,
                           bytes_accessed=int(bytes_accessed))

    kernel = _deup_cat_kernel_grouped if grouped else _deup_cat_kernel_dense
    w3a_shape = (Cg, Cg) if grouped else (P, P)

    return pl.pallas_call(
        kernel,
        out_shape=jax.ShapeDtypeStruct((R, P), out_dtype),
        grid=(grid_r,),
        in_specs=[
            pl.BlockSpec((tile, Cin), lambda i: (i, 0)),
            pl.BlockSpec((tile, P), lambda i: (i, 0)),
            pl.BlockSpec((Cin, P), lambda i: (0, 0)),
            pl.BlockSpec(w3a_shape, lambda i: (0, 0)),
            pl.BlockSpec((1, P), lambda i: (0, 0)),
        ],
        out_specs=pl.BlockSpec((tile, P), lambda i: (i, 0)),
        compiler_params=pltpu.CompilerParams(
            dimension_semantics=("parallel",),
            vmem_limit_bytes=48 * 1024 * 1024,
        ),
        cost_estimate=cost,
    )(x_flat, prev_flat, wy, w3a, b_all)


@functools.partial(jax.jit,
                   static_argnames=("tile_rows", "compute_dtype", "out_dtype", "packed_io"))
def deup_cat_pallas(x, prev, params, *, tile_rows=1024, compute_dtype=jnp.bfloat16,
                    out_dtype=None, packed_io=False):
    """Fused DeUp_Cat forward.

    packed_io=False (default, matches the PyTorch module layout):
        x: (N, Cin, D, H, W), prev: (N, Cout, 2D, 2H, 2W) -> (N, Cout, 2D, 2H, 2W)
    packed_io=True (channels-last / sub-voxel-packed contract, zero glue transposes):
        x: (N, D, H, W, Cin), prev: (N, D, H, W, 2, 2, 2, Cout) -> (N, D, H, W, 2, 2, 2, Cout)
    """
    Cout = params[2].shape[0]
    if out_dtype is None:
        out_dtype = compute_dtype     # bf16 store by default: halves the largest HBM stream

    if packed_io:
        N, D, H, W, Cin = x.shape
    else:
        N, Cin, D, H, W = x.shape
    R = N * D * H * W

    fused = _fuse_params(params, Cin, Cout, compute_dtype)
    Cg, P = fused[3], fused[4]

    if packed_io:
        x_flat = x.reshape(R, Cin)
        prev_g = prev.reshape(R, 8, Cout)
    else:
        # TODO(synk): keep the surrounding model channels-last (packed_io=True) and these
        # two transposes + the output transpose disappear entirely.
        x_flat = jnp.transpose(x, (0, 2, 3, 4, 1)).reshape(R, Cin)
        p8 = prev.reshape(N, Cout, D, 2, H, 2, W, 2)
        prev_g = jnp.transpose(p8, (0, 2, 4, 6, 3, 5, 7, 1)).reshape(R, 8, Cout)

    if Cg != Cout:  # lane-pad per group only when needed (no-op when Cout % 16 == 0)
        prev_g = jnp.pad(prev_g, ((0, 0), (0, 0), (0, Cg - Cout)))
    prev_flat = prev_g.reshape(R, P)

    out_flat = _deup_cat_core(x_flat, prev_flat, fused, tile_rows=tile_rows,
                              compute_dtype=compute_dtype, out_dtype=out_dtype)

    out_g = out_flat.reshape(N, D, H, W, 2, 2, 2, Cg)[..., :Cout]
    if packed_io:
        return out_g
    o = jnp.transpose(out_g, (0, 7, 1, 4, 2, 5, 3, 6))            # (N,C,D,2,H,2,W,2)
    return o.reshape(N, Cout, 2 * D, 2 * H, 2 * W)


def deup_cat_ref(x, prev, params):
    """Pure-JAX reference mirroring the PyTorch forward (NCDHW)."""
    conv1_w, conv1_b, conv2_w, conv2_b, conv3_w, conv3_b = params
    N, Cin, D, H, W = x.shape
    Cout = conv2_w.shape[0]
    x1 = (jnp.einsum('ncdhw,oc->nodhw', x, conv1_w.reshape(Cout, Cin))
          + conv1_b[None, :, None, None, None])
    y = jnp.einsum('ncdhw,copqr->nodphqwr', x1, conv2_w)
    y = y.reshape(N, Cout, 2 * D, 2 * H, 2 * W) + conv2_b[None, :, None, None, None]
    cat = jnp.concatenate([prev, y], axis=1)
    out = (jnp.einsum('ncdhw,oc->nodhw', cat, conv3_w.reshape(Cout, 2 * Cout))
           + conv3_b[None, :, None, None, None])
    return out


if __name__ == "__main__":
    def make_inputs(key, N, Cin, Cout, D, H, W):
        ks = jax.random.split(key, 8)
        x = jax.random.normal(ks[0], (N, Cin, D, H, W), jnp.float32)
        prev = jax.random.normal(ks[1], (N, Cout, 2 * D, 2 * H, 2 * W), jnp.float32)
        params = (
            0.2 * jax.random.normal(ks[2], (Cout, Cin), jnp.float32),
            0.1 * jax.random.normal(ks[3], (Cout,), jnp.float32),
            0.2 * jax.random.normal(ks[4], (Cout, Cout, 2, 2, 2), jnp.float32),
            0.1 * jax.random.normal(ks[5], (Cout,), jnp.float32),
            0.2 * jax.random.normal(ks[6], (Cout, 2 * Cout), jnp.float32),
            0.1 * jax.random.normal(ks[7], (Cout,), jnp.float32),
        )
        return x, prev, params

    # --- config 1: small channels (Cg=16, P=128, dense prev path) ---
    N, Cin, Cout, D, H, W = 2, 8, 4, 4, 4, 4
    x, prev, params = make_inputs(jax.random.PRNGKey(0), N, Cin, Cout, D, H, W)
    ref = jax.block_until_ready(deup_cat_ref(x, prev, params))

    out_f32 = jax.block_until_ready(
        deup_cat_pallas(x, prev, params, compute_dtype=jnp.float32, out_dtype=jnp.float32))
    out_bf16 = jax.block_until_ready(deup_cat_pallas(x, prev, params))  # bf16 stream + store

    assert out_f32.shape == (N, Cout, 2 * D, 2 * H, 2 * W)
    assert out_bf16.shape == (N, Cout, 2 * D, 2 * H, 2 * W)
    assert out_bf16.dtype == jnp.bfloat16
    assert jnp.allclose(out_f32, ref, atol=1e-4, rtol=1e-4)
    assert jnp.allclose(out_bf16.astype(jnp.float32), ref, atol=5e-2, rtol=5e-2)

    # packed / channels-last contract: no glue transposes around the kernel
    x_cl = jnp.transpose(x, (0, 2, 3, 4, 1))
    prev_pk = jnp.transpose(prev.reshape(N, Cout, D, 2, H, 2, W, 2), (0, 2, 4, 6, 3, 5, 7, 1))
    out_pk = jax.block_until_ready(deup_cat_pallas(x_cl, prev_pk, params, packed_io=True))
    assert out_pk.shape == (N, D, H, W, 2, 2, 2, Cout)
    out_pk_ncdhw = jnp.transpose(out_pk, (0, 7, 1, 4, 2, 5, 3, 6)).reshape(
        N, Cout, 2 * D, 2 * H, 2 * W)
    assert jnp.allclose(out_pk_ncdhw.astype(jnp.float32), ref, atol=5e-2, rtol=5e-2)

    # --- config 2: large channels (Cg=128 -> grouped prev kernel, no block-diag zeros) ---
    N2, Cin2, Cout2, D2, H2, W2 = 2, 32, 128, 2, 2, 2
    x2, prev2, params2 = make_inputs(jax.random.PRNGKey(1), N2, Cin2, Cout2, D2, H2, W2)
    ref2 = jax.block_until_ready(deup_cat_ref(x2, prev2, params2))
    out2 = jax.block_until_ready(
        deup_cat_pallas(x2, prev2, params2, compute_dtype=jnp.float32, out_dtype=jnp.float32))
    assert jnp.allclose(out2, ref2, atol=2e-3, rtol=2e-3)

    print("KERNEL_OK")
</pallas_src>

<mosaic_0001>
module attributes {stable_mosaic.version = 11 : i64} {
  func.func @_deup_cat_kernel_dense(%arg0: i32, %arg1: memref<64x8xf32, #tpu.memory_space<vmem>>, %arg2: memref<64x128xf32, #tpu.memory_space<vmem>>, %arg3: memref<8x128xf32, #tpu.memory_space<vmem>>, %arg4: memref<128x128xf32, #tpu.memory_space<vmem>>, %arg5: memref<1x128xf32, #tpu.memory_space<vmem>>, %arg6: memref<64x128xf32, #tpu.memory_space<vmem>>) attributes {dimension_semantics = [#tpu.dimension_semantics<parallel>], iteration_bounds = array<i64: 2>, scalar_prefetch = 0 : i64, scratch_operands = 0 : i64, tpu.core_type = #tpu.core_type<tc>, window_params = [{transform_indices = @transform_0, window_bounds = array<i64: 64, 8>}, {transform_indices = @transform_1, window_bounds = array<i64: 64, 128>}, {pipeline_mode = #tpu.pipeline_mode<synchronous>, transform_indices = @transform_2, window_bounds = array<i64: 8, 128>}, {pipeline_mode = #tpu.pipeline_mode<synchronous>, transform_indices = @transform_3, window_bounds = array<i64: 128, 128>}, {pipeline_mode = #tpu.pipeline_mode<synchronous>, transform_indices = @transform_4, window_bounds = array<i64: 1, 128>}, {transform_indices = @transform_5, window_bounds = array<i64: 64, 128>}]} {
    %c0 = arith.constant 0 : index
    %c0_0 = arith.constant 0 : index
    %0 = vector.load %arg1[%c0, %c0_0] : memref<64x8xf32, #tpu.memory_space<vmem>>, vector<64x8xf32>
    %c0_1 = arith.constant 0 : index
    %c0_2 = arith.constant 0 : index
    %1 = vector.load %arg3[%c0_1, %c0_2] : memref<8x128xf32, #tpu.memory_space<vmem>>, vector<8x128xf32>
    %cst = arith.constant dense<0.000000e+00> : vector<64x128xf32>
    %2 = tpu.matmul %0, %1, %cst {dimension_numbers = #tpu.dot_dimension_numbers<[1], [0], [0], [1], [0, 0, 1, 1], [], []>} : vector<64x8xf32>, vector<8x128xf32>, vector<64x128xf32> -> vector<64x128xf32>
    %c0_3 = arith.constant 0 : index
    %c0_4 = arith.constant 0 : index
    %3 = vector.load %arg2[%c0_3, %c0_4] : memref<64x128xf32, #tpu.memory_space<vmem>>, vector<64x128xf32>
    %c0_5 = arith.constant 0 : index
    %c0_6 = arith.constant 0 : index
    %4 = vector.load %arg4[%c0_5, %c0_6] : memref<128x128xf32, #tpu.memory_space<vmem>>, vector<128x128xf32>
    %cst_7 = arith.constant dense<0.000000e+00> : vector<64x128xf32>
    %5 = tpu.matmul %3, %4, %cst_7 {dimension_numbers = #tpu.dot_dimension_numbers<[1], [0], [0], [1], [0, 0, 1, 1], [], []>} : vector<64x128xf32>, vector<128x128xf32>, vector<64x128xf32> -> vector<64x128xf32>
    %6 = arith.addf %2, %5 : vector<64x128xf32>
    %c0_8 = arith.constant 0 : index
    %c0_9 = arith.constant 0 : index
    %7 = vector.load %arg5[%c0_8, %c0_9] : memref<1x128xf32, #tpu.memory_space<vmem>>, vector<1x128xf32>
    %8 = vector.broadcast %7 : vector<1x128xf32> to vector<64x128xf32>
    %9 = arith.addf %6, %8 : vector<64x128xf32>
    %c0_10 = arith.constant 0 : index
    %c0_11 = arith.constant 0 : index
    %10 = vector.load %arg6[%c0_10, %c0_11] : memref<64x128xf32, #tpu.memory_space<vmem>>, vector<64x128xf32>
    tpu.vector_store %arg6[%c0_10, %c0_11], %9 {strides = array<i32>} : memref<64x128xf32, #tpu.memory_space<vmem>>, vector<64x128xf32>,
    return
  }
  func.func @transform_0(%arg0: i32) -> (i32, i32) {
    %c0_i32 = arith.constant 0 : i32
    %c0_i32_0 = arith.constant 0 : i32
    return %arg0, %c0_i32 : i32, i32
  }
  func.func @transform_1(%arg0: i32) -> (i32, i32) {
    %c0_i32 = arith.constant 0 : i32
    %c0_i32_0 = arith.constant 0 : i32
    return %arg0, %c0_i32 : i32, i32
  }
  func.func @transform_2(%arg0: i32) -> (i32, i32) {
    %c0_i32 = arith.constant 0 : i32
    %c0_i32_0 = arith.constant 0 : i32
    %c0_i32_1 = arith.constant 0 : i32
    return %c0_i32, %c0_i32_0 : i32, i32
  }
  func.func @transform_3(%arg0: i32) -> (i32, i32) {
    %c0_i32 = arith.constant 0 : i32
    %c0_i32_0 = arith.constant 0 : i32
    %c0_i32_1 = arith.constant 0 : i32
    return %c0_i32, %c0_i32_0 : i32, i32
  }
  func.func @transform_4(%arg0: i32) -> (i32, i32) {
    %c0_i32 = arith.constant 0 : i32
    %c0_i32_0 = arith.constant 0 : i32
    %c0_i32_1 = arith.constant 0 : i32
    return %c0_i32, %c0_i32_0 : i32, i32
  }
  func.func @transform_5(%arg0: i32) -> (i32, i32) {
    %c0_i32 = arith.constant 0 : i32
    %c0_i32_0 = arith.constant 0 : i32
    return %arg0, %c0_i32 : i32, i32
  }
}

</mosaic_0001>

<bundles_post_ra>
// kernel: deup_cat_pallas.1
= control target key start
LH: loop header
LB: loop body
LE: loop exit
PB: predicated region body
PF: predicated region fallthrough
CT: control target
= control target key end

     0   :  { %s768_s18 = smov 0   ;;  %s885_s0 = inlined_call_operand.vmem [shape: f32[128,8], index: 0, kind: input, shape index: {}]   ;;  %s886_s1 = inlined_call_operand.vmem [shape: f32[128,128], index: 1, kind: input, shape index: {}]   ;;  %s887_s2 = inlined_call_operand.vmem [shape: f32[8,128], index: 2, kind: input, shape index: {}]   ;;  %s888_s3 = inlined_call_operand.vmem [shape: f32[128,128], index: 3, kind: input, shape index: {}]   ;;  %s889_s4 = inlined_call_operand.vmem [shape: f32[1,128], index: 4, kind: input, shape index: {}]   ;;  %s890_s5 = inlined_call_operand.vmem [shape: f32[128,128], index: 5, kind: output, shape index: {}]  }
   0x1 LB: > { %s609_s19 = sadd.s32 4294967295, %s736_s18   ;;  %p613_p0 = scmp.ge.s32.totalorder %s736_s18, 1  ;;  %s736_s18 = sphi %s768_s18, %s15_s18  }
   0x2   : > { %p199_p1 = scmp.lt.s32.totalorder %s736_s18, 3 }
   0x4   : > { %p200_p2 = pnand %p613_p0, %p199_p1 }
   0x5   : > { %s614_s24 = sshll.u32 (!%p200_p2), %s609_s19, 3 }
   0x6   : > { %203 = sbr.rel (%p200_p2) target bundleno = 256 (0x100), region = 40  ;;  %p233_p3 = scmp.lt.s32.totalorder (!%p200_p2), %s614_s24, 15 }
   0xb   : > { %v282_v0 = vld [vmem:[%s888_s3 + $0x78] sm:$0xff]  ;;  %v281_v1 = vld [vmem:[%s888_s3 + $0x70] sm:$0xff]  ;;  %v280_v2 = vld [vmem:[%s888_s3 + $0x68] sm:$0xff]  ;;  %s892_s24 = smov (!%p233_p3, %s614_s24), 15  ;;  %vm388_vm0 = vcmask 64512  }
   0xc   : > { %664 = vmatprep.subr.mxu0 %v282_v0  ;;  %v279_v3 = vld [vmem:[%s888_s3 + $0x60] sm:$0xff]  ;;  %s791_s6 = sshll.u32 %s892_s24, 3  ;;  %v278_v5 = vld [vmem:[%s888_s3 + $0x58] sm:$0xff]  ;;  %v277_v9 = vld [vmem:[%s888_s3 + $0x50] sm:$0xff] }
   0xd   : > { %665 = vmatpush3.msra.mxu0 %v282_v0  ;;  %v258_v4 = vld [vmem:[%s887_s2] sm:$0xff]  ;;  %s800_s11 = scalar_lea.vmem %s885_s0, %s791_s6  ;;  %s806_s14 = scalar_lea.vmem %s886_s1, %s791_s6  ;;  %v276_v11 = vld [vmem:[%s888_s3 + $0x48] sm:$0xff]  ;;  %v274_v15 = vld [vmem:[%s888_s3 + $0x38] sm:$0xff] }
   0xe   : > { %666 = vmatprep.subr.mxu0 %v281_v1  ;;  %708 = vmatprep.subr.mxu1 %v258_v4  ;;  %v250_v6 = vld [vmem:[%s800_s11] sm:$0xff]  ;;  %v251_v7 = vld [vmem:[%s800_s11 + $0x8] sm:$0xff]  ;;  %v252_v10 = vld [vmem:[%s800_s11 + $0x10] sm:$0xff]  ;;  %s872_s20 = scalar_lea.vmem %s890_s5, %s791_s6 }
   0xf   : > { %667 = vmatpush3.msra.mxu0 %v281_v1  ;;  %709 = vmatpush3.msra.mxu1 %v258_v4  ;;  %v259_v8 = vld [vmem:[%s806_s14] sm:$0xff]  ;;  %v253_v12 = vld [vmem:[%s800_s11 + $0x18] sm:$0xff]  ;;  %v255_v16 = vld [vmem:[%s800_s11 + $0x28] sm:$0xff] }
  0x10   : > { %668 = vmatprep.subr.mxu0 %v280_v2  ;;  %710 = vmatprep.mubr.msk.f32.mxu1 %vm388_vm0, %v250_v6  ;;  %v254_v13 = vld [vmem:[%s800_s11 + $0x20] sm:$0xff]  ;;  %v256_v17 = vld [vmem:[%s800_s11 + $0x30] sm:$0xff]  ;;  %v272_v19 = vld [vmem:[%s888_s3 + $0x28] sm:$0xff] }
  0x11   : > { %669 = vmatpush3.msra.mxu0 %v280_v2  ;;  %711 = vmatmul.mubr.msk.f32.vlgmr.msra.gmra.mxu1 %vm388_vm0, %v251_v7  ;;  %v275_v14 = vld [vmem:[%s888_s3 + $0x40] sm:$0xff]  ;;  %v273_v18 = vld [vmem:[%s888_s3 + $0x30] sm:$0xff]  ;;  %v257_v20 = vld [vmem:[%s800_s11 + $0x38] sm:$0xff] }
  0x12   : > { %670 = vmatprep.subr.mxu0 %v279_v3  ;;  %696 = vmatprep.mubr.f32.mxu0 %v259_v8  ;;  %v271_v21 = vld [vmem:[%s888_s3 + $0x20] sm:$0xff]  ;;  %v270_v22 = vld [vmem:[%s888_s3 + $0x18] sm:$0xff]  ;;  %v269_v23 = vld [vmem:[%s888_s3 + $0x10] sm:$0xff] }
  0x13   : > { %671 = vmatpush3.msra.mxu0 %v279_v3  ;;  %713 = vmatprep.mubr.msk.f32.mxu1 %vm388_vm0, %v252_v10  ;;  %v268_v24 = vld [vmem:[%s888_s3 + $0x8] sm:$0xff]  ;;  %v267_v25 = vld [vmem:[%s888_s3] sm:$0xff]  ;;  %v261_v27 = vld [vmem:[%s806_s14 + $0x10] sm:$0xff] }
  0x14   : > { %672 = vmatprep.subr.mxu0 %v278_v5  ;;  %v260_v26 = vld [vmem:[%s806_s14 + $0x8] sm:$0xff]  ;;  %v262_v28 = vld [vmem:[%s806_s14 + $0x18] sm:$0xff]  ;;  %v263_v29 = vld [vmem:[%s806_s14 + $0x20] sm:$0xff] }
  0x15   : > { %673 = vmatpush3.msra.mxu0 %v278_v5  ;;  %714 = vmatmul.mubr.msk.f32.gmra.mxu1 %vm388_vm0, %v253_v12  ;;  %v264_v30 = vld [vmem:[%s806_s14 + $0x28] sm:$0xff]  ;;  %v265_v31 = vld [vmem:[%s806_s14 + $0x30] sm:$0xff]  ;;  %v266_v32 = vld [vmem:[%s806_s14 + $0x38] sm:$0xff] }
  0x16   : > { %674 = vmatprep.subr.mxu0 %v277_v9  ;;  %716 = vmatprep.mubr.msk.f32.mxu1 %vm388_vm0, %v254_v13  ;;  %v628_v38 = vld [vmem:[%s889_s4] ss:$0 sm:$0xff] }
  0x17   : > { %675 = vmatpush3.msra.mxu0 %v277_v9 }
  0x18   : > { %676 = vmatprep.subr.mxu0 %v276_v11 }
  0x19   : > { %677 = vmatpush3.msra.mxu0 %v276_v11  ;;  %717 = vmatmul.mubr.msk.f32.gmra.mxu1 %vm388_vm0, %v255_v16 }
  0x1a   : > { %678 = vmatprep.subr.mxu0 %v275_v14  ;;  %719 = vmatprep.mubr.msk.f32.mxu1 %vm388_vm0, %v256_v17 }
  0x1b   : > { %679 = vmatpush3.msra.mxu0 %v275_v14 }
  0x1c   : > { %680 = vmatprep.subr.mxu0 %v274_v15 }
  0x1d   : > { %681 = vmatpush3.msra.mxu0 %v274_v15  ;;  %720 = vmatmul.mubr.msk.f32.gmra.mxu1 %vm388_vm0, %v257_v20 }
  0x1e   : > { %682 = vmatprep.subr.mxu0 %v273_v18 }
  0x1f   : > { %683 = vmatpush3.msra.mxu0 %v273_v18 }
  0x20   : > { %684 = vmatprep.subr.mxu0 %v272_v19 }
  0x21   : > { %685 = vmatpush3.msra.mxu0 %v272_v19 }
  0x22   : > { %686 = vmatprep.subr.mxu0 %v271_v21 }
  0x23   : > { %687 = vmatpush3.msra.mxu0 %v271_v21 }
  0x24   : > { %688 = vmatprep.subr.mxu0 %v270_v22 }
  0x25   : > { %689 = vmatpush3.msra.mxu0 %v270_v22 }
  0x26   : > { %690 = vmatprep.subr.mxu0 %v269_v23 }
  0x27   : > { %691 = vmatpush3.msra.mxu0 %v269_v23 }
  0x28   : > { %692 = vmatprep.subr.mxu0 %v268_v24 }
  0x29   : > { %693 = vmatpush3.msra.mxu0 %v268_v24 }
  0x2a   : > { %694 = vmatprep.subr.mxu0 %v267_v25 }
  0x2b   : > { %695 = vmatpush3.msra.mxu0 %v267_v25 }
  0x2c   : > { %697 = vmatmul.mubr.f32.vlgmr.msra.gmra.mxu0 %v260_v26 }
  0x2d   : > { %699 = vmatprep.mubr.f32.mxu0 %v261_v27 }
  0x30   : > { %700 = vmatmul.mubr.f32.gmra.mxu0 %v262_v28 }
  0x31   : > { %702 = vmatprep.mubr.f32.mxu0 %v263_v29 }
  0x34   : > { %703 = vmatmul.mubr.f32.gmra.mxu0 %v264_v30 }
  0x35   : > { %705 = vmatprep.mubr.f32.mxu0 %v265_v31 }
  0x38   : > { %706 = vmatmul.mubr.f32.gmra.mxu0 %v266_v32 }
  0xd1   : > { %v712_v33 = vpop.f32.mrf.mxu1 }
  0xd3   : > { %v479_v34 = vpop.f32.mrf.mxu1 }
  0xd5   : > { %v715_v35 = vpop.f32.mrf.mxu1 }
  0xd7   : > { %v489_v36 = vpop.f32.mrf.mxu1 }
  0xd9   : > { %v718_v41 = vpop.f32.mrf.mxu1 }
  0xdb   : > { %v499_v48 = vpop.f32.mrf.mxu1 }
  0xdd   : > { %v721_v55 = vpop.f32.mrf.mxu1 }
  0xdf   : > { %v509_v61 = vpop.f32.mrf.mxu1 }
  0xec   : > { %v698_v37 = vpop.f32.mrf.mxu0 }
  0xed   : > { %v485_v39 = vadd.f32 %v712_v33, %v698_v37 }
  0xee   : > { %v349_v40 = vpop.f32.mrf.mxu0 }
  0xef   : > { %v526_v42 = vadd.f32 %v628_v38, %v485_v39  ;;  %v480_v43 = vadd.f32 %v479_v34, %v349_v40 }
  0xf0   : > { %v701_v44 = vpop.f32.mrf.mxu0 }
  0xf1   : > { %534 = vst [vmem:[%s872_s20 + $0x8] sm:$0xff] %v526_v42  ;;  %v525_v45 = vadd.f32 %v628_v38, %v480_v43  ;;  %v495_v46 = vadd.f32 %v715_v35, %v701_v44 }
  0xf2   : > { %v359_v47 = vpop.f32.mrf.mxu0 }
  0xf3   : > { %533 = vst [vmem:[%s872_s20] sm:$0xff] %v525_v45  ;;  %v528_v49 = vadd.f32 %v628_v38, %v495_v46  ;;  %v490_v50 = vadd.f32 %v489_v36, %v359_v47 }
  0xf4   : > { %v704_v51 = vpop.f32.mrf.mxu0 }
  0xf5   : > { %536 = vst [vmem:[%s872_s20 + $0x18] sm:$0xff] %v528_v49  ;;  %v527_v52 = vadd.f32 %v628_v38, %v490_v50  ;;  %v505_v53 = vadd.f32 %v718_v41, %v704_v51 }
  0xf6   : > { %v369_v54 = vpop.f32.mrf.mxu0 }
  0xf7   : > { %535 = vst [vmem:[%s872_s20 + $0x10] sm:$0xff] %v527_v52  ;;  %v530_v56 = vadd.f32 %v628_v38, %v505_v53  ;;  %v500_v57 = vadd.f32 %v499_v48, %v369_v54 }
  0xf8   : > { %v707_v58 = vpop.f32.mrf.mxu0 }
  0xf9   : > { %538 = vst [vmem:[%s872_s20 + $0x28] sm:$0xff] %v530_v56  ;;  %v529_v59 = vadd.f32 %v628_v38, %v500_v57  ;;  %v515_v60 = vadd.f32 %v721_v55, %v707_v58 }
  0xfa   : > { %v379_v62 = vpop.f32.mrf.mxu0 }
  0xfb   : > { %537 = vst [vmem:[%s872_s20 + $0x20] sm:$0xff] %v529_v59  ;;  %v532_v63 = vadd.f32 %v628_v38, %v515_v60  ;;  %v510_v0 = vadd.f32 %v509_v61, %v379_v62 }
  0xfd   : > { %540 = vst [vmem:[%s872_s20 + $0x38] sm:$0xff] %v532_v63  ;;  %v531_v1 = vadd.f32 %v628_v38, %v510_v0 }
  0xff   : > { %539 = vst [vmem:[%s872_s20 + $0x30] sm:$0xff] %v531_v1 }
 0x100 PF: > { %s15_s18 = sadd.s32 1, %s736_s18  }
 0x101   : > { %p12_p4 = scmp.ge.s32.totalorder %s15_s18, 4  }
 0x103   :  { %14 = sbr.rel (!%p12_p4) target bundleno = 1 (0x1), region = 73 }

</bundles_post_ra>
